<compile_context>
chip_gen: v7x
topology: tpu7x:2x2x1
jax: 0.10.0
libtpu: 0.0.40
codegen_flags: <defaults>
</compile_context>

<pallas_src>
import math
import jax
import jax.numpy as jnp
from jax.experimental import pallas as pl
from jax.experimental.pallas import tpu as pltpu


def adaptformer_kernel(x_ref,                # (tm, Din)      input dtype
                       gamma_ref, beta_ref,  # (1, Din)       f32 LayerNorm affine
                       wd_ref, bd_ref,       # (Din, Dbn_p)   mm dtype / (1, Dbn_p) f32
                       wu_ref, bu_ref,       # (Dbn_p, Dout_p) mm dtype (scale folded)
                                             # (1, Dout_p)    f32 (scale folded)
                       o_ref):               # (tm, Dout_p)   input dtype
    mm_dtype = wd_ref.dtype          # wrapper guarantees this is the narrower dtype
    inv_d = 1.0 / x_ref.shape[-1]    # compile-time constant

    # --- NonHalfLayerNorm: f32 math, single-pass statistics -----------------
    x = x_ref[...].astype(jnp.float32)
    s1 = jnp.sum(x, axis=-1, keepdims=True)
    s2 = jnp.sum(x * x, axis=-1, keepdims=True)
    mean = s1 * inv_d
    var = jnp.maximum(s2 * inv_d - mean * mean, 0.0)   # guard tiny negatives
    xn = (x - mean) * jax.lax.rsqrt(var + 1e-5)
    xn = xn * gamma_ref[...] + beta_ref[...]
    # Single cast to the dtype the MXU consumes (narrower of input / weight
    # dtype): keeps bf16 weights on the fast bf16 MXU path even for f32 x.
    xn = xn.astype(mm_dtype)

    # --- down projection (native dtype on MXU, f32 accumulation) + ReLU -----
    h = jnp.dot(xn, wd_ref[...], preferred_element_type=jnp.float32) + bd_ref[...]
    h = jnp.maximum(h, 0.0).astype(wu_ref.dtype)

    # --- up projection (AdaptFormer scale already folded into wu/bu) --------
    y = jnp.dot(h, wu_ref[...], preferred_element_type=jnp.float32) + bu_ref[...]
    o_ref[...] = y.astype(o_ref.dtype)


def _round_up(a, b):
    return ((a + b - 1) // b) * b


def _vmem_limit_bytes():
    """Generation-aware scoped-VMEM limit (~3/4 of physical per-core VMEM)."""
    phys = None
    try:
        phys = int(pltpu.get_tpu_info().vmem_capacity_bytes)
    except Exception:
        phys = None
    if not phys or phys <= 0:
        phys = 64 * 1024 * 1024        # v7x per-TC VMEM: smallest current gen
    # 48 MiB on v7x (64 MiB/TC), 96 MiB on v5e/v6e (128 MiB physical).
    return (phys * 3) // 4


def adaptformer(x, params, *, tm=512):
    """x: (B, S, Din).  params: dict of jnp arrays (see init_params)."""
    B, S, Din = x.shape
    Dbn = params["wd"].shape[1]
    Dout = params["wu"].shape[1]
    in_dtype = x.dtype
    w_dtype = params["wd"].dtype

    # MXU operand dtype = narrower of (input dtype, weight dtype).
    mm_dtype = (w_dtype
                if jnp.dtype(w_dtype).itemsize <= jnp.dtype(in_dtype).itemsize
                else in_dtype)
    mm_bytes = jnp.dtype(mm_dtype).itemsize
    x_bytes = jnp.dtype(in_dtype).itemsize

    N = B * S
    x2 = x.reshape(N, Din)

    # ---- one-time wrapper-side weight prep (tiny XLA ops) ------------------
    scale = params["scale"].astype(jnp.float32).reshape(())
    wd = params["wd"].astype(mm_dtype)
    bd = params["bd"].astype(jnp.float32).reshape(1, Dbn)
    wu = (params["wu"].astype(jnp.float32) * scale).astype(mm_dtype)
    bu = (params["bu"].astype(jnp.float32) * scale).reshape(1, Dout)
    gamma = params["gamma"].astype(jnp.float32).reshape(1, Din)
    beta = params["beta"].astype(jnp.float32).reshape(1, Din)

    # Lane-pad bottleneck (exact: relu(0 + 0) = 0 feeds zero-padded W_up rows)
    # and the output dim, so both matmuls use full 128-lane width and output
    # stores are unmasked.  Keep 128 (not 256): kernel is HBM-bound, a wider
    # pad only wastes FLOPs and weight VMEM, and 128 fits v5e's MXU exactly.
    Dbn_p = max(128, _round_up(Dbn, 128))
    Dout_p = max(128, _round_up(Dout, 128))
    if Dbn_p != Dbn:
        wd = jnp.pad(wd, ((0, 0), (0, Dbn_p - Dbn)))
        bd = jnp.pad(bd, ((0, 0), (0, Dbn_p - Dbn)))
        wu = jnp.pad(wu, ((0, Dbn_p - Dbn), (0, 0)))
    if Dout_p != Dout:
        wu = jnp.pad(wu, ((0, 0), (0, Dout_p - Dout)))
        bu = jnp.pad(bu, ((0, 0), (0, Dout_p - Dout)))

    # ---- generation-aware VMEM budget & row tiling --------------------------
    vmem_limit = _vmem_limit_bytes()
    budget = vmem_limit - (2 << 20)              # headroom for compiler scratch

    # Constants are resident once (single-buffered via pl.Buffered(1)).
    const_bytes = ((Din * Dbn_p + Dbn_p * Dout_p) * mm_bytes
                   + (Dbn_p + Dout_p + 2 * Din) * 4)

    def _tile_bytes(t):
        blocks = 2 * t * (Din + Dout_p) * x_bytes          # dbl-buffered x/out tiles
        scratch = t * (2 * Din + Dbn_p + Dout_p) * 4       # f32 x/xn, f32 h, f32 y
        return blocks + scratch

    sub = 16 if in_dtype == jnp.bfloat16 else 8            # sublane-packing minimum
    tm = max(sub, (min(tm, _round_up(N, sub)) // sub) * sub)
    while tm > sub and const_bytes + _tile_bytes(tm) > budget:
        tm = max(sub, ((tm // 2) // sub) * sub)
    # Ensure >= 2 grid steps so dimension_semantics=("parallel",) can actually
    # shard across v7x's two TensorCores for small B*S.
    while tm > sub and pl.cdiv(N, tm) < 2:
        tm = max(sub, ((tm // 2) // sub) * sub)

    Npad = _round_up(N, tm)
    if Npad != N:
        x2 = jnp.pad(x2, ((0, Npad - N), (0, 0)))

    def _call(single_buffer_consts):
        cmode = ({"pipeline_mode": pl.Buffered(1)} if single_buffer_consts else {})
        return pl.pallas_call(
            adaptformer_kernel,
            out_shape=jax.ShapeDtypeStruct((Npad, Dout_p), in_dtype),
            grid_spec=pltpu.PrefetchScalarGridSpec(
                num_scalar_prefetch=0,
                grid=(Npad // tm,),
                in_specs=[
                    pl.BlockSpec((tm, Din), lambda i: (i, 0)),               # x tile
                    pl.BlockSpec((1, Din), lambda i: (0, 0), **cmode),       # gamma
                    pl.BlockSpec((1, Din), lambda i: (0, 0), **cmode),       # beta
                    pl.BlockSpec((Din, Dbn_p), lambda i: (0, 0), **cmode),   # W_down
                    pl.BlockSpec((1, Dbn_p), lambda i: (0, 0), **cmode),     # b_down
                    pl.BlockSpec((Dbn_p, Dout_p), lambda i: (0, 0), **cmode),  # W_up
                    pl.BlockSpec((1, Dout_p), lambda i: (0, 0), **cmode),    # b_up
                ],
                out_specs=pl.BlockSpec((tm, Dout_p), lambda i: (i, 0)),
            ),
            compiler_params=pltpu.CompilerParams(
                dimension_semantics=("parallel",),
                vmem_limit_bytes=int(vmem_limit)),
        )(x2, gamma, beta, wd, bd, wu, bu)

    try:
        out = _call(True)
    except Exception:
        # pipeline_mode / pl.Buffered(1) unsupported on this jax version:
        # fall back to default double-buffered constants (correct, a bit more
        # VMEM; tm clamp already keeps >= 2 MiB of headroom).
        out = _call(False)

    out = out[:N, :Dout]
    return out.reshape(B, S, Dout)


def init_params(key, in_dim, bottle_dim, out_dim=None, dtype=jnp.float32):
    out_dim = in_dim if out_dim is None else out_dim
    k_down, k_up = jax.random.split(key, 2)

    # NonHalfLayerNorm: weight=1, bias=0, always float32.
    gamma = jnp.ones((in_dim,), jnp.float32)
    beta = jnp.zeros((in_dim,), jnp.float32)

    # down: kaiming_uniform(a=sqrt(5)) -> bound = 1/sqrt(fan_in); bias = 0.
    bound = 1.0 / math.sqrt(in_dim)
    wd = jax.random.uniform(k_down, (in_dim, bottle_dim), dtype,
                            minval=-bound, maxval=bound)
    bd = jnp.zeros((bottle_dim,), dtype)

    # up: module init zeroes these; use small deterministic random values so
    # the kernel's hot path is exercised with a non-trivial output.
    # (set wu/bu to zeros to match the module's __init__ exactly)
    wu = 0.01 * jax.random.normal(k_up, (bottle_dim, out_dim), dtype)
    bu = jnp.zeros((out_dim,), dtype)

    scale = jnp.ones((), dtype)   # AdaptFormer scale (torch.ones([]))

    return dict(gamma=gamma, beta=beta, wd=wd, bd=bd, wu=wu, bu=bu, scale=scale)


def adaptformer_ref(x, p):
    """Pure-JAX reference matching the PyTorch forward."""
    xf = x.astype(jnp.float32)
    mean = jnp.mean(xf, axis=-1, keepdims=True)
    var = jnp.mean((xf - mean) ** 2, axis=-1, keepdims=True)
    xn = (xf - mean) / jnp.sqrt(var + 1e-5)
    xn = (xn * p["gamma"] + p["beta"]).astype(x.dtype)
    h = jnp.maximum(xn @ p["wd"] + p["bd"], 0.0)
    y = h @ p["wu"] + p["bu"]
    return y * p["scale"]


if __name__ == "__main__":
    B, S, Din, Dbn = 2, 8, 32, 16
    key = jax.random.PRNGKey(0)
    kx, kp = jax.random.split(key)

    x = jax.random.normal(kx, (B, S, Din), jnp.float32)
    params = init_params(kp, Din, Dbn)
    params["scale"] = jnp.asarray(0.5, jnp.float32)   # exercise the scale fold

    out = jax.block_until_ready(adaptformer(x, params))

    ref = adaptformer_ref(x, params)
    assert out.shape == (B, S, Din)
    assert jnp.allclose(out, ref, atol=1e-4, rtol=1e-4), "mismatch vs reference"

    print("KERNEL_OK")
</pallas_src>

<mosaic_0001>
module attributes {stable_mosaic.version = 11 : i64} {
  func.func @adaptformer_kernel(%arg0: i32, %arg1: memref<8x32xf32, #tpu.memory_space<vmem>>, %arg2: memref<1x32xf32, #tpu.memory_space<vmem>>, %arg3: memref<1x32xf32, #tpu.memory_space<vmem>>, %arg4: memref<32x128xf32, #tpu.memory_space<vmem>>, %arg5: memref<1x128xf32, #tpu.memory_space<vmem>>, %arg6: memref<128x128xf32, #tpu.memory_space<vmem>>, %arg7: memref<1x128xf32, #tpu.memory_space<vmem>>, %arg8: memref<8x128xf32, #tpu.memory_space<vmem>>) attributes {dimension_semantics = [#tpu.dimension_semantics<parallel>], iteration_bounds = array<i64: 2>, scalar_prefetch = 0 : i64, scratch_operands = 0 : i64, tpu.core_type = #tpu.core_type<tc>, window_params = [{transform_indices = @transform_0, window_bounds = array<i64: 8, 32>}, {pipeline_mode = #tpu.pipeline_mode<synchronous>, transform_indices = @transform_1, window_bounds = array<i64: 1, 32>}, {pipeline_mode = #tpu.pipeline_mode<synchronous>, transform_indices = @transform_2, window_bounds = array<i64: 1, 32>}, {pipeline_mode = #tpu.pipeline_mode<synchronous>, transform_indices = @transform_3, window_bounds = array<i64: 32, 128>}, {pipeline_mode = #tpu.pipeline_mode<synchronous>, transform_indices = @transform_4, window_bounds = array<i64: 1, 128>}, {pipeline_mode = #tpu.pipeline_mode<synchronous>, transform_indices = @transform_5, window_bounds = array<i64: 128, 128>}, {pipeline_mode = #tpu.pipeline_mode<synchronous>, transform_indices = @transform_6, window_bounds = array<i64: 1, 128>}, {transform_indices = @transform_7, window_bounds = array<i64: 8, 128>}]} {
    %c0 = arith.constant 0 : index
    %c0_0 = arith.constant 0 : index
    %0 = vector.load %arg1[%c0, %c0_0] : memref<8x32xf32, #tpu.memory_space<vmem>>, vector<8x32xf32>
    %cst = arith.constant dense<0.000000e+00> : vector<8xf32>
    %1 = vector.multi_reduction <add>, %0, %cst [1] : vector<8x32xf32> to vector<8xf32>
    %2 = vector.shape_cast %1 : vector<8xf32> to vector<8x1xf32>
    %3 = arith.mulf %0, %0 : vector<8x32xf32>
    %cst_1 = arith.constant dense<0.000000e+00> : vector<8xf32>
    %4 = vector.multi_reduction <add>, %3, %cst_1 [1] : vector<8x32xf32> to vector<8xf32>
    %5 = vector.shape_cast %4 : vector<8xf32> to vector<8x1xf32>
    %cst_2 = arith.constant 3.125000e-02 : f32
    %6 = vector.broadcast %cst_2 : f32 to vector<8x1xf32>
    %7 = arith.mulf %2, %6 : vector<8x1xf32>
    %cst_3 = arith.constant 3.125000e-02 : f32
    %8 = vector.broadcast %cst_3 : f32 to vector<8x1xf32>
    %9 = arith.mulf %5, %8 : vector<8x1xf32>
    %10 = arith.mulf %7, %7 : vector<8x1xf32>
    %11 = arith.subf %9, %10 : vector<8x1xf32>
    %cst_4 = arith.constant 0.000000e+00 : f32
    %12 = vector.broadcast %cst_4 : f32 to vector<8x1xf32>
    %13 = arith.maximumf %11, %12 : vector<8x1xf32>
    %14 = vector.broadcast %7 : vector<8x1xf32> to vector<8x32xf32>
    %15 = arith.subf %0, %14 : vector<8x32xf32>
    %cst_5 = arith.constant 9.99999974E-6 : f32
    %16 = vector.broadcast %cst_5 : f32 to vector<8x1xf32>
    %17 = arith.addf %13, %16 : vector<8x1xf32>
    %18 = math.rsqrt %17 : vector<8x1xf32>
    %19 = vector.broadcast %18 : vector<8x1xf32> to vector<8x32xf32>
    %20 = arith.mulf %15, %19 : vector<8x32xf32>
    %c0_6 = arith.constant 0 : index
    %c0_7 = arith.constant 0 : index
    %21 = vector.load %arg2[%c0_6, %c0_7] : memref<1x32xf32, #tpu.memory_space<vmem>>, vector<1x32xf32>
    %22 = vector.broadcast %21 : vector<1x32xf32> to vector<8x32xf32>
    %23 = arith.mulf %20, %22 : vector<8x32xf32>
    %c0_8 = arith.constant 0 : index
    %c0_9 = arith.constant 0 : index
    %24 = vector.load %arg3[%c0_8, %c0_9] : memref<1x32xf32, #tpu.memory_space<vmem>>, vector<1x32xf32>
    %25 = vector.broadcast %24 : vector<1x32xf32> to vector<8x32xf32>
    %26 = arith.addf %23, %25 : vector<8x32xf32>
    %c0_10 = arith.constant 0 : index
    %c0_11 = arith.constant 0 : index
    %27 = vector.load %arg4[%c0_10, %c0_11] : memref<32x128xf32, #tpu.memory_space<vmem>>, vector<32x128xf32>
    %cst_12 = arith.constant dense<0.000000e+00> : vector<8x128xf32>
    %28 = tpu.matmul %26, %27, %cst_12 {dimension_numbers = #tpu.dot_dimension_numbers<[1], [0], [0], [1], [0, 0, 1, 1], [], []>} : vector<8x32xf32>, vector<32x128xf32>, vector<8x128xf32> -> vector<8x128xf32>
    %c0_13 = arith.constant 0 : index
    %c0_14 = arith.constant 0 : index
    %29 = vector.load %arg5[%c0_13, %c0_14] : memref<1x128xf32, #tpu.memory_space<vmem>>, vector<1x128xf32>
    %30 = vector.broadcast %29 : vector<1x128xf32> to vector<8x128xf32>
    %31 = arith.addf %28, %30 : vector<8x128xf32>
    %cst_15 = arith.constant 0.000000e+00 : f32
    %32 = vector.broadcast %cst_15 : f32 to vector<8x128xf32>
    %33 = arith.maximumf %31, %32 : vector<8x128xf32>
    %c0_16 = arith.constant 0 : index
    %c0_17 = arith.constant 0 : index
    %34 = vector.load %arg6[%c0_16, %c0_17] : memref<128x128xf32, #tpu.memory_space<vmem>>, vector<128x128xf32>
    %cst_18 = arith.constant dense<0.000000e+00> : vector<8x128xf32>
    %35 = tpu.matmul %33, %34, %cst_18 {dimension_numbers = #tpu.dot_dimension_numbers<[1], [0], [0], [1], [0, 0, 1, 1], [], []>} : vector<8x128xf32>, vector<128x128xf32>, vector<8x128xf32> -> vector<8x128xf32>
    %c0_19 = arith.constant 0 : index
    %c0_20 = arith.constant 0 : index
    %36 = vector.load %arg7[%c0_19, %c0_20] : memref<1x128xf32, #tpu.memory_space<vmem>>, vector<1x128xf32>
    %37 = vector.broadcast %36 : vector<1x128xf32> to vector<8x128xf32>
    %38 = arith.addf %35, %37 : vector<8x128xf32>
    %c0_21 = arith.constant 0 : index
    %c0_22 = arith.constant 0 : index
    %39 = vector.load %arg8[%c0_21, %c0_22] : memref<8x128xf32, #tpu.memory_space<vmem>>, vector<8x128xf32>
    tpu.vector_store %arg8[%c0_21, %c0_22], %38 {strides = array<i32>} : memref<8x128xf32, #tpu.memory_space<vmem>>, vector<8x128xf32>,
    return
  }
  func.func @transform_0(%arg0: i32) -> (i32, i32) {
    %c0_i32 = arith.constant 0 : i32
    %c0_i32_0 = arith.constant 0 : i32
    return %arg0, %c0_i32 : i32, i32
  }
  func.func @transform_1(%arg0: i32) -> (i32, i32) {
    %c0_i32 = arith.constant 0 : i32
    %c0_i32_0 = arith.constant 0 : i32
    %c0_i32_1 = arith.constant 0 : i32
    return %c0_i32, %c0_i32_0 : i32, i32
  }
  func.func @transform_2(%arg0: i32) -> (i32, i32) {
    %c0_i32 = arith.constant 0 : i32
    %c0_i32_0 = arith.constant 0 : i32
    %c0_i32_1 = arith.constant 0 : i32
    return %c0_i32, %c0_i32_0 : i32, i32
  }
  func.func @transform_3(%arg0: i32) -> (i32, i32) {
    %c0_i32 = arith.constant 0 : i32
    %c0_i32_0 = arith.constant 0 : i32
    %c0_i32_1 = arith.constant 0 : i32
    return %c0_i32, %c0_i32_0 : i32, i32
  }
  func.func @transform_4(%arg0: i32) -> (i32, i32) {
    %c0_i32 = arith.constant 0 : i32
    %c0_i32_0 = arith.constant 0 : i32
    %c0_i32_1 = arith.constant 0 : i32
    return %c0_i32, %c0_i32_0 : i32, i32
  }
  func.func @transform_5(%arg0: i32) -> (i32, i32) {
    %c0_i32 = arith.constant 0 : i32
    %c0_i32_0 = arith.constant 0 : i32
    %c0_i32_1 = arith.constant 0 : i32
    return %c0_i32, %c0_i32_0 : i32, i32
  }
  func.func @transform_6(%arg0: i32) -> (i32, i32) {
    %c0_i32 = arith.constant 0 : i32
    %c0_i32_0 = arith.constant 0 : i32
    %c0_i32_1 = arith.constant 0 : i32
    return %c0_i32, %c0_i32_0 : i32, i32
  }
  func.func @transform_7(%arg0: i32) -> (i32, i32) {
    %c0_i32 = arith.constant 0 : i32
    %c0_i32_0 = arith.constant 0 : i32
    return %arg0, %c0_i32 : i32, i32
  }
}

module attributes {stable_mosaic.version = 11 : i64} {
  func.func @adaptformer_kernel(%arg0: i32, %arg1: memref<8x32xf32, #tpu.memory_space<vmem>>, %arg2: memref<1x32xf32, #tpu.memory_space<vmem>>, %arg3: memref<1x32xf32, #tpu.memory_space<vmem>>, %arg4: memref<32x128xf32, #tpu.memory_space<vmem>>, %arg5: memref<1x128xf32, #tpu.memory_space<vmem>>, %arg6: memref<128x128xf32, #tpu.memory_space<vmem>>, %arg7: memref<1x128xf32, #tpu.memory_space<vmem>>, %arg8: memref<8x128xf32, #tpu.memory_space<vmem>>) attributes {dimension_semantics = [#tpu.dimension_semantics<parallel>], iteration_bounds = array<i64: 2>, scalar_prefetch = 0 : i64, scratch_operands = 0 : i64, tpu.core_type = #tpu.core_type<tc>, window_params = [{transform_indices = @transform_0, window_bounds = array<i64: 8, 32>}, {pipeline_mode = #tpu.pipeline_mode<synchronous>, transform_indices = @transform_1, window_bounds = array<i64: 1, 32>}, {pipeline_mode = #tpu.pipeline_mode<synchronous>, transform_indices = @transform_2, window_bounds = array<i64: 1, 32>}, {pipeline_mode = #tpu.pipeline_mode<synchronous>, transform_indices = @transform_3, window_bounds = array<i64: 32, 128>}, {pipeline_mode = #tpu.pipeline_mode<synchronous>, transform_indices = @transform_4, window_bounds = array<i64: 1, 128>}, {pipeline_mode = #tpu.pipeline_mode<synchronous>, transform_indices = @transform_5, window_bounds = array<i64: 128, 128>}, {pipeline_mode = #tpu.pipeline_mode<synchronous>, transform_indices = @transform_6, window_bounds = array<i64: 1, 128>}, {transform_indices = @transform_7, window_bounds = array<i64: 8, 128>}]} {
    %c0 = arith.constant 0 : index
    %c0_0 = arith.constant 0 : index
    %0 = vector.load %arg1[%c0, %c0_0] : memref<8x32xf32, #tpu.memory_space<vmem>>, vector<8x32xf32>
    %cst = arith.constant dense<0.000000e+00> : vector<8xf32>
    %1 = vector.multi_reduction <add>, %0, %cst [1] : vector<8x32xf32> to vector<8xf32>
    %2 = vector.shape_cast %1 : vector<8xf32> to vector<8x1xf32>
    %3 = arith.mulf %0, %0 : vector<8x32xf32>
    %cst_1 = arith.constant dense<0.000000e+00> : vector<8xf32>
    %4 = vector.multi_reduction <add>, %3, %cst_1 [1] : vector<8x32xf32> to vector<8xf32>
    %5 = vector.shape_cast %4 : vector<8xf32> to vector<8x1xf32>
    %cst_2 = arith.constant 3.125000e-02 : f32
    %6 = vector.broadcast %cst_2 : f32 to vector<8x1xf32>
    %7 = arith.mulf %2, %6 : vector<8x1xf32>
    %cst_3 = arith.constant 3.125000e-02 : f32
    %8 = vector.broadcast %cst_3 : f32 to vector<8x1xf32>
    %9 = arith.mulf %5, %8 : vector<8x1xf32>
    %10 = arith.mulf %7, %7 : vector<8x1xf32>
    %11 = arith.subf %9, %10 : vector<8x1xf32>
    %cst_4 = arith.constant 0.000000e+00 : f32
    %12 = vector.broadcast %cst_4 : f32 to vector<8x1xf32>
    %13 = arith.maximumf %11, %12 : vector<8x1xf32>
    %14 = vector.broadcast %7 : vector<8x1xf32> to vector<8x32xf32>
    %15 = arith.subf %0, %14 : vector<8x32xf32>
    %cst_5 = arith.constant 9.99999974E-6 : f32
    %16 = vector.broadcast %cst_5 : f32 to vector<8x1xf32>
    %17 = arith.addf %13, %16 : vector<8x1xf32>
    %18 = math.rsqrt %17 : vector<8x1xf32>
    %19 = vector.broadcast %18 : vector<8x1xf32> to vector<8x32xf32>
    %20 = arith.mulf %15, %19 : vector<8x32xf32>
    %c0_6 = arith.constant 0 : index
    %c0_7 = arith.constant 0 : index
    %21 = vector.load %arg2[%c0_6, %c0_7] : memref<1x32xf32, #tpu.memory_space<vmem>>, vector<1x32xf32>
    %22 = vector.broadcast %21 : vector<1x32xf32> to vector<8x32xf32>
    %23 = arith.mulf %20, %22 : vector<8x32xf32>
    %c0_8 = arith.constant 0 : index
    %c0_9 = arith.constant 0 : index
    %24 = vector.load %arg3[%c0_8, %c0_9] : memref<1x32xf32, #tpu.memory_space<vmem>>, vector<1x32xf32>
    %25 = vector.broadcast %24 : vector<1x32xf32> to vector<8x32xf32>
    %26 = arith.addf %23, %25 : vector<8x32xf32>
    %c0_10 = arith.constant 0 : index
    %c0_11 = arith.constant 0 : index
    %27 = vector.load %arg4[%c0_10, %c0_11] : memref<32x128xf32, #tpu.memory_space<vmem>>, vector<32x128xf32>
    %cst_12 = arith.constant dense<0.000000e+00> : vector<8x128xf32>
    %28 = tpu.matmul %26, %27, %cst_12 {dimension_numbers = #tpu.dot_dimension_numbers<[1], [0], [0], [1], [0, 0, 1, 1], [], []>} : vector<8x32xf32>, vector<32x128xf32>, vector<8x128xf32> -> vector<8x128xf32>
    %c0_13 = arith.constant 0 : index
    %c0_14 = arith.constant 0 : index
    %29 = vector.load %arg5[%c0_13, %c0_14] : memref<1x128xf32, #tpu.memory_space<vmem>>, vector<1x128xf32>
    %30 = vector.broadcast %29 : vector<1x128xf32> to vector<8x128xf32>
    %31 = arith.addf %28, %30 : vector<8x128xf32>
    %cst_15 = arith.constant 0.000000e+00 : f32
    %32 = vector.broadcast %cst_15 : f32 to vector<8x128xf32>
    %33 = arith.maximumf %31, %32 : vector<8x128xf32>
    %c0_16 = arith.constant 0 : index
    %c0_17 = arith.constant 0 : index
    %34 = vector.load %arg6[%c0_16, %c0_17] : memref<128x128xf32, #tpu.memory_space<vmem>>, vector<128x128xf32>
    %cst_18 = arith.constant dense<0.000000e+00> : vector<8x128xf32>
    %35 = tpu.matmul %33, %34, %cst_18 {dimension_numbers = #tpu.dot_dimension_numbers<[1], [0], [0], [1], [0, 0, 1, 1], [], []>} : vector<8x128xf32>, vector<128x128xf32>, vector<8x128xf32> -> vector<8x128xf32>
    %c0_19 = arith.constant 0 : index
    %c0_20 = arith.constant 0 : index
    %36 = vector.load %arg7[%c0_19, %c0_20] : memref<1x128xf32, #tpu.memory_space<vmem>>, vector<1x128xf32>
    %37 = vector.broadcast %36 : vector<1x128xf32> to vector<8x128xf32>
    %38 = arith.addf %35, %37 : vector<8x128xf32>
    %c0_21 = arith.constant 0 : index
    %c0_22 = arith.constant 0 : index
    %39 = vector.load %arg8[%c0_21, %c0_22] : memref<8x128xf32, #tpu.memory_space<vmem>>, vector<8x128xf32>
    tpu.vector_store %arg8[%c0_21, %c0_22], %38 {strides = array<i32>} : memref<8x128xf32, #tpu.memory_space<vmem>>, vector<8x128xf32>,
    return
  }
  func.func @transform_0(%arg0: i32) -> (i32, i32) {
    %c0_i32 = arith.constant 0 : i32
    %c0_i32_0 = arith.constant 0 : i32
    return %arg0, %c0_i32 : i32, i32
  }
  func.func @transform_1(%arg0: i32) -> (i32, i32) {
    %c0_i32 = arith.constant 0 : i32
    %c0_i32_0 = arith.constant 0 : i32
    %c0_i32_1 = arith.constant 0 : i32
    return %c0_i32, %c0_i32_0 : i32, i32
  }
  func.func @transform_2(%arg0: i32) -> (i32, i32) {
    %c0_i32 = arith.constant 0 : i32
    %c0_i32_0 = arith.constant 0 : i32
    %c0_i32_1 = arith.constant 0 : i32
    return %c0_i32, %c0_i32_0 : i32, i32
  }
  func.func @transform_3(%arg0: i32) -> (i32, i32) {
    %c0_i32 = arith.constant 0 : i32
    %c0_i32_0 = arith.constant 0 : i32
    %c0_i32_1 = arith.constant 0 : i32
    return %c0_i32, %c0_i32_0 : i32, i32
  }
  func.func @transform_4(%arg0: i32) -> (i32, i32) {
    %c0_i32 = arith.constant 0 : i32
    %c0_i32_0 = arith.constant 0 : i32
    %c0_i32_1 = arith.constant 0 : i32
    return %c0_i32, %c0_i32_0 : i32, i32
  }
  func.func @transform_5(%arg0: i32) -> (i32, i32) {
    %c0_i32 = arith.constant 0 : i32
    %c0_i32_0 = arith.constant 0 : i32
    %c0_i32_1 = arith.constant 0 : i32
    return %c0_i32, %c0_i32_0 : i32, i32
  }
  func.func @transform_6(%arg0: i32) -> (i32, i32) {
    %c0_i32 = arith.constant 0 : i32
    %c0_i32_0 = arith.constant 0 : i32
    %c0_i32_1 = arith.constant 0 : i32
    return %c0_i32, %c0_i32_0 : i32, i32
  }
  func.func @transform_7(%arg0: i32) -> (i32, i32) {
    %c0_i32 = arith.constant 0 : i32
    %c0_i32_0 = arith.constant 0 : i32
    return %arg0, %c0_i32 : i32, i32
  }
}

</mosaic_0001>

<bundles_post_ra>
// kernel: tpu_custom_call.1
= control target key start
LH: loop header
LB: loop body
LE: loop exit
PB: predicated region body
PF: predicated region fallthrough
CT: control target
= control target key end

     0   :  { %12 = vsyncpa [#allocation3], 0  ;;  %s1293_s0 = inlined_call_operand.hbm [shape: f32[16,32], index: 0, kind: input, shape index: {}]   ;;  %s1294_s1 = inlined_call_operand.vmem [shape: f32[1,32], index: 1, kind: input, shape index: {}]   ;;  %s1295_s2 = inlined_call_operand.vmem [shape: f32[1,32], index: 2, kind: input, shape index: {}]   ;;  %s1296_s3 = inlined_call_operand.hbm [shape: f32[32,128], index: 3, kind: input, shape index: {}]   ;;  %s1297_s4 = inlined_call_operand.vmem [shape: f32[1,128], index: 4, kind: input, shape index: {}]   ;;  %s1298_s5 = inlined_call_operand.hbm [shape: f32[128,128], index: 5, kind: input, shape index: {}]   ;;  %s1299_s6 = inlined_call_operand.vmem [shape: f32[1,128], index: 6, kind: input, shape index: {}]   ;;  %s1300_s7 = inlined_call_operand.hbm [shape: f32[16,128], index: 7, kind: output, shape index: {}]  }
   0x1   :  { %14 = vsyncpa [#allocation3 + $0x1], 0 }
   0x2   :  { %15 = vsyncpa [#allocation6], 0 }
   0x3   :  { %16 = vsyncpa [#allocation4], 0 }
   0x4   :  { %18 = vsyncpa [#allocation4 + $0x1], 0  ;;  %s1039_s24 = smov 0   ;;  %s1041_s25 = smov 0  }
   0x5   :  { %s1043_s26 = smov 0   ;;  %s1045_s27 = smov 0  }
   0x6 LB: > { %s1060_s28 = sadd.s32 4294967295, %s988_s27   ;;  %s639_s29 = sadd.s32 4294967294, %s988_s27   ;;  %s988_s27 = sphi %s1045_s27, %s1320_s27   ;;  %s984_s26 = sphi %s1043_s26, %s1319_s26   ;;  %s980_s25 = sphi %s1041_s25, %s1318_s25   ;;  %s976_s24 = sphi %s1039_s24, %s1317_s24  }
   0x7   : > { %p44_p0 = scmp.ne.s32.totalorder %s980_s25, %s976_s24  ;;  %p1301_p1 = scmp.eq.s32.totalorder %s1060_s28, 0 }
   0x8   : > { %p200_p3 = scmp.eq.s32.totalorder %s639_s29, 1  ;;  %p640_p5 = scmp.ge.s32.totalorder %s988_s27, 1 }
   0x9   : > { %p1069_p4 = por %p1301_p1, %p44_p0  ;;  %p207_p7 = scmp.lt.s32.totalorder %s988_s27, 3 }
   0xa   : > { %p1074_p6 = por %p200_p3, %p44_p0  ;;  %s990_s10 = smov [#allocation5]  }
   0xb   : > { %s1304_s30 = scalar_select %p1069_p4, 1, 0 }
   0xc   : > { %s1305_s8 = scalar_select %p1074_p6, 1, 0 }
   0xd   : > { %p1079_p8 = pnand %p640_p5, %p207_p7  ;;  %s225_s11 = sshll.u32 %s990_s10, 4  ;;  %s1083_s11 = int_to_ptr.vmem [resolvable:$true] %s225_s11 }
   0xe   : > { %s991_s13 = smov [#allocation7]   ;;  %s832_s17 = scalar_lea.hbm %s1296_s3, 512 }
   0xf   : > { %p770_p9 = pneg %p1079_p8  ;;  %s241_s14 = sshll.u32 %s991_s13, 4  ;;  %s1094_s14 = int_to_ptr.vmem [resolvable:$true] %s241_s14 }
  0x10   : > { %p833_p12 = scmp.ne.s32.totalorder %s1296_s3, %s832_s17  ;;  %p839_p5 = scmp.lt.u32.totalorder %s832_s17, %s1296_s3 }
  0x11   : > { %p1090_p11 = pnand %p770_p9, %p1301_p1 }
  0x13   : > { %p834_p13 = pneg %p1090_p11 }
  0x15   : > { %p835_p0 = pnand %p834_p13, %p833_p12 }
  0x17   : > { %p836_p3 = pneg %p835_p0 }
  0x19   : > { %p841_p7 = pnand %p839_p5, %p836_p3 }
  0x1b   : > { %844 = shalt.err (!%p841_p7)
}
  0x1c   : > { %s845_s22 = scalar_lea.vmem %s1083_s11, 512  ;;  %p853_p2 = scmp.lt.s32.totalorder %s1083_s11, %s1083_s11 }
  0x1d   : > { %p846_p9 = scmp.ne.s32.totalorder %s1083_s11, %s845_s22  ;;  %p854_p12 = scmp.lt.s32.totalorder %s845_s22, %s845_s22 }
  0x1f   : > { %p848_p10 = pnand %p846_p9, %p834_p13  ;;  %p855_p0 = por %p854_p12, %p853_p2 }
  0x21   : > { %p849_p1 = pneg %p848_p10 }
  0x23   : > { %p856_p6 = pnand %p855_p0, %p849_p1 }
  0x25   : > { %859 = shalt.err (!%p856_p6)
}
  0x26   : > { %s992_s23 = smov 128   ;;  %s993_s29 = smov 8  }
  0x27   : > { %773 = dma.hbm_to_vmem [thread:$0]  (!%p1090_p11), %s1296_s3, 512, %s1083_s11, [#allocation6], %s992_s23, %s992_s23, %s993_s29  }
  0x28   : > { %s860_s17 = scalar_lea.hbm %s1298_s5, 2048 }
  0x29   : > { %p861_p2 = scmp.ne.s32.totalorder %s1298_s5, %s860_s17  ;;  %p867_p10 = scmp.lt.u32.totalorder %s860_s17, %s1298_s5 }
  0x2b   : > { %p863_p1 = pnand %p861_p2, %p834_p13 }
  0x2d   : > { %p864_p6 = pneg %p863_p1 }
  0x2f   : > { %p869_p3 = pnand %p867_p10, %p864_p6 }
  0x31   : > { %872 = shalt.err (!%p869_p3)
}
  0x32   : > { %s873_s11 = scalar_lea.vmem %s1094_s14, 2048  ;;  %p881_p12 = scmp.lt.s32.totalorder %s1094_s14, %s1094_s14 }
  0x33   : > { %p874_p5 = scmp.ne.s32.totalorder %s1094_s14, %s873_s11  ;;  %p882_p0 = scmp.lt.s32.totalorder %s873_s11, %s873_s11 }
  0x35   : > { %p876_p7 = pnand %p874_p5, %p834_p13  ;;  %p883_p2 = por %p882_p0, %p881_p12 }
  0x37   : > { %p877_p9 = pneg %p876_p7 }
  0x39   : > { %p884_p1 = pnand %p883_p2, %p877_p9 }
  0x3b   : > { %887 = shalt.err (!%p884_p1)
}
  0x3c   : > { %776 = dma.hbm_to_vmem [thread:$0]  (!%p1090_p11), %s1298_s5, 2048, %s1094_s14, [#allocation6], %s992_s23, %s992_s23, %s993_s29  }
  0x3d   : > { %s1149_s13 = sadd.s32 1, %s988_s27   ;;  %s31_s12 = sadd.s32 1, %s984_s26 }
  0x3e   : > { %s28_s15 = ssub.s32 %s988_s27, %s1149_s13  ;;  %p38_p13 = scmp.ne.s32.totalorder %s984_s26, %s980_s25 }
  0x3f   : > { %p29_p6 = scmp.eq.s32.totalorder %s28_s15, 0  ;;  %p39_p10 = scmp.eq.s32.totalorder %s988_s27, 0 }
  0x40   : > { %p1308_p3 = scmp.eq.s32.totalorder %s1060_s28, 1  ;;  %p787_p7 = scmp.lt.s32.totalorder %s988_s27, 2 }
  0x41   : > { %s1165_s17 = scalar_select %p29_p6, %s984_s26, %s31_s12  }
  0x42   : > { %p1159_p5 = por %p1308_p3, %p38_p13  ;;  %p40_p9 = por %p39_p10, %p38_p13 }
  0x43   : > { %s258_s18 = sand.u32 1, %s984_s26   ;;  %s645_s14 = sshll.u32 %s988_s27, 7 }
  0x44   : > { %s1309_s16 = scalar_select %p1159_p5, 1, 0 }
  0x45   : > { %s644_s19 = sshll.u32 %s258_s18, 3  ;;  %s1172_s20 = scalar_lea.hbm %s1293_s0, %s645_s14 }
  0x46   : > { %s262_s21 = scalar_lea.vmem [#allocation2], %s644_s19  ;;  %p1176_p11 = pnand %p787_p7, %p40_p9 }
  0x47   : > { %s269_s11 = sshll.u32 %s262_s21, 4  ;;  %s259_s10 = scalar_lea.sflag [#allocation3], %s258_s18  ;;  %s1174_s11 = int_to_ptr.vmem [resolvable:$true] %s269_s11 }
  0x48   : > { %s888_s12 = scalar_lea.hbm %s1172_s20, 128  ;;  %p890_p0 = pneg %p1176_p11 }
  0x49   : > { %p889_p12 = scmp.ne.s32.totalorder %s1172_s20, %s888_s12  ;;  %s893_s14 = scalar_lea.hbm %s1293_s0, 256 }
  0x4a   : > { %p894_p13 = scmp.lt.u32.totalorder %s1172_s20, %s1293_s0  ;;  %p895_p6 = scmp.lt.u32.totalorder %s893_s14, %s888_s12 }
  0x4b   : > { %p891_p2 = pnand %p890_p0, %p889_p12  ;;  %p897_p3 = scmp.lt.u32.totalorder %s888_s12, %s1172_s20 }
  0x4c   : > { %p896_p10 = por %p895_p6, %p894_p13 }
  0x4d   : > { %p892_p1 = pneg %p891_p2 }
  0x4e   : > { %p898_p7 = por %p897_p3, %p896_p10 }
  0x50   : > { %p899_p9 = pnand %p898_p7, %p892_p1 }
  0x52   : > { %902 = shalt.err (!%p899_p9)
}
  0x53   : > { %s903_s18 = scalar_lea.vmem %s1174_s11, 128  ;;  %s994_s21 = smov [#allocation2]  }
  0x54   : > { %p904_p12 = scmp.ne.s32.totalorder %s1174_s11, %s903_s18  ;;  %s908_s15 = sshll.u32 %s994_s21, 4  ;;  %s909_s15 = int_to_ptr.vmem [resolvable:$false] %s908_s15 }
  0x55   : > { %s910_s19 = scalar_lea.vmem %s909_s15, 256  ;;  %p911_p4 = scmp.lt.s32.totalorder %s1174_s11, %s909_s15 }
  0x56   : > { %p906_p2 = pnand %p904_p12, %p890_p0  ;;  %p912_p13 = scmp.lt.s32.totalorder %s910_s19, %s903_s18 }
  0x58   : > { %p907_p5 = pneg %p906_p2  ;;  %p913_p6 = por %p912_p13, %p911_p4 }
  0x5a   : > { %p914_p10 = pnand %p913_p6, %p907_p5 }
  0x5c   : > { %917 = shalt.err (!%p914_p10)
}
  0x5d   : > { %780 = dma.hbm_to_vmem [thread:$0]  (!%p1176_p11), %s1172_s20, 128, %s1174_s11, %s259_s10  }
  0x5e   : > { %278 = sbr.rel (%p1079_p8) target bundleno = 722 (0x2d2), region = 48  ;;  %s1208_s12 = sand.u32 (!%p1079_p8), 1, %s980_s25  }
  0x5f   : > { %s647_s14 = sshll.u32 (!%p1079_p8), %s1208_s12, 3  ;;  %s281_s23 = scalar_lea.sflag (!%p1079_p8), [#allocation3], %s1208_s12 }
  0x60   : > { %s284_s29 = scalar_lea.vmem (!%p1079_p8), [#allocation2], %s647_s14  ;;  %p1311_p4 = scmp.ne.s32.totalorder (!%p1079_p8), %s1304_s30, 0 }
  0x65   : > { %963 = dma.done.wait (%p1311_p4), %s281_s23, 128  }
  0x66   : > { %965 = vsyncadd (%p1311_p4), %s281_s23, 4294967168  ;;  %p1312_p5 = scmp.eq.s32.totalorder %s1060_s28, 0 }
  0x68   : > { %967 = dma.done.wait (%p1312_p5), [#allocation6], 2560   ;;  %p1313_p8 = pmov %p1312_p5 }
  0x69   : > { %vm324_vm0 = vcmask 261120   ;;  %v1222_v0 = vld [vmem:[%s284_s29] sm:$0xff]  ;;  %v357_v4 = vld [vmem:[#allocation5] sm:$0xff]  ;;  %v358_v5 = vld [vmem:[#allocation5 + $0x8] sm:$0xff]  ;;  %v995_v7 = vmov 0.0|0.0   ;;  %vm996_vm1 = vmmov 0  }
  0x6a   : > { %969 = vsyncadd (%p1313_p8), [#allocation6], 4294964736  ;;  %v325_v1 = vsel %vm324_vm0, %v1222_v0, 0.0  ;;  %v328_v2 = vmul.f32 %v1222_v0, %v1222_v0  ;;  %v359_v6 = vld [vmem:[#allocation5 + $0x10] sm:$0xff]  ;;  %728 = vmatprep.subr.bf16.mxu0 %v995_v7  ;;  %v729_v8 = vpack.c.bf16 %v358_v5, %v357_v4  ;;  %v360_v9 = vld [vmem:[#allocation5 + $0x18] sm:$0xff]  ;;  %v997_v10 = vmov 0.0   ;;  %734 = vmatprep.subr.bf16.mxu1 %v995_v7 }
  0x6b   : > { %326 = vadd.xlane.f32.xlu0 %v325_v1  ;;  %690 = vmatprep.mubr.msk.f32.mxu0 %vm996_vm1, %v997_v10  ;;  %v732_v11 = vpack.c.bf16 %v360_v9, %v359_v6  ;;  %v442_v12 = vld [vmem:[#allocation7] sm:$0xff]  ;;  %v443_v13 = vld [vmem:[#allocation7 + $0x8] sm:$0xff]  ;;  %v444_v14 = vld [vmem:[#allocation7 + $0x10] sm:$0xff]  ;;  %s657_s15 = sshll.u32 %s1060_s28, 7  ;;  %s322_s19 = scalar_lea.vmem [#allocation8], %s647_s14 }
  0x6c   : > { %v329_v3 = vsel %vm324_vm0, %v328_v2, 0.0  ;;  %725 = vmatprep.mubr.msk.f32.mxu1 %vm996_vm1, %v997_v10  ;;  %730 = vmatpush3.bf16.msra.mxu0 %v729_v8  ;;  %v735_v15 = vpack.c.bf16 %v443_v13, %v442_v12  ;;  %v445_v16 = vld [vmem:[#allocation7 + $0x18] sm:$0xff]  ;;  %v446_v18 = vld [vmem:[#allocation7 + $0x20] sm:$0xff]  ;;  %v447_v19 = vld [vmem:[#allocation7 + $0x28] sm:$0xff]  ;;  %s550_s23 = sshll.u32 %s322_s19, 4  ;;  %s1249_s9 = scalar_lea.hbm %s1300_s7, %s657_s15  ;;  %s1251_s23 = int_to_ptr.vmem [resolvable:$true] %s550_s23 }
  0x6d   : > { %731 = vmatprep.subr.bf16.mxu0 %v995_v7  ;;  %v738_v17 = vpack.c.bf16 %v445_v16, %v444_v14  ;;  %v741_v20 = vpack.c.bf16 %v447_v19, %v446_v18  ;;  %v448_v21 = vld [vmem:[#allocation7 + $0x30] sm:$0xff]  ;;  %v449_v22 = vld [vmem:[#allocation7 + $0x38] sm:$0xff]  ;;  %v450_v24 = vld [vmem:[#allocation7 + $0x40] sm:$0xff]  ;;  %s537_s20 = scalar_lea.sflag [#allocation4], %s1208_s12  ;;  %s918_s11 = scalar_lea.vmem %s1251_s23, 128 }
  0x6e   : > { %736 = vmatpush3.bf16.msra.mxu1 %v735_v15  ;;  %v744_v23 = vpack.c.bf16 %v449_v22, %v448_v21  ;;  %v451_v25 = vld [vmem:[#allocation7 + $0x48] sm:$0xff]  ;;  %v452_v27 = vld [vmem:[#allocation7 + $0x50] sm:$0xff]  ;;  %v453_v28 = vld [vmem:[#allocation7 + $0x58] sm:$0xff]  ;;  %p919_p11 = scmp.ne.s32.totalorder %s1251_s23, %s918_s11  ;;  %p1314_p0 = scmp.ne.s32.totalorder %s1309_s16, 0 }
  0x6f   : > { %330 = vadd.xlane.f32.xlu0 %v329_v3  ;;  %737 = vmatprep.subr.bf16.mxu1 %v995_v7  ;;  %v747_v26 = vpack.c.bf16 %v451_v25, %v450_v24  ;;  %v750_v29 = vpack.c.bf16 %v453_v28, %v452_v27  ;;  %v454_v30 = vld [vmem:[#allocation7 + $0x60] sm:$0xff]  ;;  %v455_v31 = vld [vmem:[#allocation7 + $0x68] sm:$0xff]  ;;  %v651_v43 = vld [vmem:[%s1294_s1] ss:$0 sm:$0xff]  ;;  %s998_s28 = smov [#allocation8]  }
  0x70   : > { %733 = vmatpush3.bf16.msra.mxu0 %v732_v11  ;;  %v753_v32 = vpack.c.bf16 %v455_v31, %v454_v30  ;;  %v652_v45 = vld [vmem:[%s1295_s2] ss:$0 sm:$0xff]  ;;  %v457_v49 = vld [vmem:[#allocation7 + $0x78] sm:$0xff]  ;;  %p920_p1 = pnand %p919_p11, %p1314_p0  ;;  %s922_s14 = sshll.u32 %s998_s28, 4  ;;  %s923_s14 = int_to_ptr.vmem [resolvable:$false] %s922_s14 }
  0x71   : > { %v456_v48 = vld [vmem:[#allocation7 + $0x70] sm:$0xff]  ;;  %s924_s22 = scalar_lea.vmem %s923_s14, 256  ;;  %p925_p7 = scmp.lt.s32.totalorder %s1251_s23, %s923_s14 }
  0x72   : > { %739 = vmatpush3.bf16.msra.mxu1 %v738_v17  ;;  %v756_v50 = vpack.c.bf16 %v457_v49, %v456_v48  ;;  %v653_v51 = vld [vmem:[%s1297_s4] ss:$0 sm:$0xff]  ;;  %p921_p3 = pneg %p920_p1  ;;  %p926_p9 = scmp.lt.s32.totalorder %s924_s22, %s918_s11 }
  0x73   : > { %740 = vmatprep.subr.bf16.mxu1 %v995_v7  ;;  %v655_v56 = vld [vmem:[%s1299_s6] ss:$0 sm:$0xff] }
  0x74   : > { %p927_p12 = por %p926_p9, %p925_p7 }
  0x76   : > { %742 = vmatpush3.bf16.msra.mxu1 %v741_v20  ;;  %p928_p2 = pnand %p927_p12, %p921_p3 }
  0x77   : > { %743 = vmatprep.subr.bf16.mxu1 %v995_v7 }
  0x7a   : > { %745 = vmatpush3.bf16.msra.mxu1 %v744_v23 }
  0x7b   : > { %746 = vmatprep.subr.bf16.mxu1 %v995_v7 }
  0x7e   : > { %748 = vmatpush3.bf16.msra.mxu1 %v747_v26 }
  0x7f   : > { %749 = vmatprep.subr.bf16.mxu1 %v995_v7 }
  0x82   : > { %751 = vmatpush3.bf16.msra.mxu1 %v750_v29 }
  0x83   : > { %752 = vmatprep.subr.bf16.mxu1 %v995_v7 }
  0x86   : > { %754 = vmatpush3.bf16.msra.mxu1 %v753_v32 }
  0x87   : > { %755 = vmatprep.subr.bf16.mxu1 %v995_v7 }
  0x8a   : > { %757 = vmatpush3.bf16.msra.mxu1 %v756_v50 }
  0xf8   : > { %v327_v33 = vpop.xlane.xlu0 %326 }
  0xf9   : > { %v332_v34 = vmul.f32 0.03125, %v327_v33 }
  0xfb   : > { %v334_v36 = vmul.f32 %v332_v34, %v332_v34  ;;  %v337_v41 = vsub.f32 %v1222_v0, %v332_v34 }
  0xfc   : > { %v331_v35 = vpop.xlane.xlu0 %330 }
  0xfd   : > { %v333_v37 = vmul.f32 0.03125, %v331_v35 }
  0xff   : > { %v335_v38 = vsub.f32 %v333_v37, %v334_v36 }
 0x101   : > { %v336_v39 = vmax.f32 %v335_v38, 0.0 }
 0x103   : > { %v338_v40 = vadd.f32 1e-05, %v336_v39 }
 0x105   : > { %830 = vrsqrt.f32 %v338_v40 }
 0x10f   : > { %v831_v42 = vpop.eup %830 }
 0x110   : > { %v340_v44 = vmul.f32 %v831_v42, %v337_v41 }
 0x112   : > { %v348_v46 = vmul.f32 %v651_v43, %v340_v44 }
 0x114   : > { %v356_v47 = vadd.f32 %v652_v45, %v348_v46 }
 0x116   : > { %691 = vmatmul.mubr.msk.f32.vlgmr.msra.gmra.mrb[0].mxu0 %vm324_vm0, %v356_v47 }
 0x1e9   : > { %v437_v52 = vpop.f32.mrb[0].mxu0 }
 0x1ea   : > { %v438_v53 = vadd.f32 %v653_v51, %v437_v52  ;;  %v692_v54 = vpop.f32.mrb[1].mxu0 }
 0x1ec   : > { %v441_v55 = vmax.f32 %v438_v53, 0.0 }
 0x1ee   : > { %726 = vmatmul.mubr.f32.vlgmr.msra.gmra.mrb[0].mxu1 %v441_v55 }
 0x2c1   : > { %v531_v57 = vpop.f32.mrb[0].mxu1 }
 0x2c2   : > { %v532_v58 = vadd.f32 %v655_v56, %v531_v57  ;;  %v727_v59 = vpop.f32.mrb[1].mxu1 }
 0x2c4   : > { %535 = vst [vmem:[%s322_s19] sm:$0xff] %v532_v58 }
 0x2c5   : > { %931 = shalt.err (!%p928_p2)
}
 0x2c6   : > { %s932_s12 = scalar_lea.hbm %s1249_s9, 128  ;;  %s936_s21 = scalar_lea.hbm %s1300_s7, 256 }
 0x2c7   : > { %p933_p13 = scmp.ne.s32.totalorder %s1249_s9, %s932_s12  ;;  %p937_p4 = scmp.lt.u32.totalorder %s1249_s9, %s1300_s7 }
 0x2c8   : > { %p938_p5 = scmp.lt.u32.totalorder %s936_s21, %s932_s12  ;;  %p940_p11 = scmp.lt.u32.totalorder %s932_s12, %s1249_s9 }
 0x2c9   : > { %p934_p6 = pnand %p933_p13, %p1314_p0 }
 0x2ca   : > { %p939_p8 = por %p938_p5, %p937_p4 }
 0x2cb   : > { %p935_p10 = pneg %p934_p6 }
 0x2cc   : > { %p941_p1 = por %p940_p11, %p939_p8 }
 0x2ce   : > { %p942_p3 = pnand %p941_p1, %p935_p10 }
 0x2d0   : > { %945 = shalt.err (!%p942_p3)
}
 0x2d1   : > { %768 = dma.vmem_to_hbm [thread:$0]  (%p1314_p0), %s1251_s23, 128, %s1249_s9, %s537_s20  }
 0x2d2 PF: > { %s562_s29 = sand.u32 1, %s976_s24   ;;  %p1315_p7 = scmp.ne.s32.totalorder %s1305_s8, 0 }
 0x2d3   : > { %p1316_p9 = scmp.ge.s32.totalorder %s988_s27, 2  ;;  %s563_s30 = scalar_lea.sflag [#allocation4], %s562_s29 }
 0x2d5   : > { %p782_p12 = pnand %p1316_p9, %p1315_p7 }
 0x2d7   : > { %971 = dma.done.wait (!%p782_p12), %s563_s30, 128  }
 0x2d8   : > { %973 = vsyncadd (!%p782_p12), %s563_s30, 4294967168  ;;  %p21_p2 = scmp.ge.s32.totalorder %s1149_s13, 4   ;;  %s1317_s24 = smov %s980_s25 }
 0x2d9   : > { %s1318_s25 = smov %s984_s26  ;;  %s1319_s26 = smov %s1165_s17 }
 0x2da   : > { %s1320_s27 = smov %s1149_s13  ;;  %23 = sbr.rel (!%p21_p2) target bundleno = 6 (0x6), region = 101 }
 0x2e1   :  { %568 = vsyncpa [#allocation3], 1 }
 0x2e2   :  { %570 = vsyncpa [#allocation3 + $0x1], 1 }
 0x2e3   :  { %571 = vsyncpa [#allocation6], 1 }
 0x2e4   :  { %572 = vsyncpa [#allocation4], 1 }
 0x2e5   :  { %574 = vsyncpa [#allocation4 + $0x1], 1 }

// kernel: tpu_custom_call.1
= control target key start
LH: loop header
LB: loop body
LE: loop exit
PB: predicated region body
PF: predicated region fallthrough
CT: control target
= control target key end

     0   :  { %12 = vsyncpa [#allocation3], 0  ;;  %s1293_s0 = inlined_call_operand.hbm [shape: f32[16,32], index: 0, kind: input, shape index: {}]   ;;  %s1294_s1 = inlined_call_operand.vmem [shape: f32[1,32], index: 1, kind: input, shape index: {}]   ;;  %s1295_s2 = inlined_call_operand.vmem [shape: f32[1,32], index: 2, kind: input, shape index: {}]   ;;  %s1296_s3 = inlined_call_operand.hbm [shape: f32[32,128], index: 3, kind: input, shape index: {}]   ;;  %s1297_s4 = inlined_call_operand.vmem [shape: f32[1,128], index: 4, kind: input, shape index: {}]   ;;  %s1298_s5 = inlined_call_operand.hbm [shape: f32[128,128], index: 5, kind: input, shape index: {}]   ;;  %s1299_s6 = inlined_call_operand.vmem [shape: f32[1,128], index: 6, kind: input, shape index: {}]   ;;  %s1300_s7 = inlined_call_operand.hbm [shape: f32[16,128], index: 7, kind: output, shape index: {}]  }
   0x1   :  { %14 = vsyncpa [#allocation3 + $0x1], 0 }
   0x2   :  { %15 = vsyncpa [#allocation6], 0 }
   0x3   :  { %16 = vsyncpa [#allocation4], 0 }
   0x4   :  { %18 = vsyncpa [#allocation4 + $0x1], 0  ;;  %s1039_s24 = smov 0   ;;  %s1041_s25 = smov 0  }
   0x5   :  { %s1043_s26 = smov 0   ;;  %s1045_s27 = smov 0  }
   0x6 LB: > { %s1060_s28 = sadd.s32 4294967295, %s988_s27   ;;  %s639_s29 = sadd.s32 4294967294, %s988_s27   ;;  %s988_s27 = sphi %s1045_s27, %s1320_s27   ;;  %s984_s26 = sphi %s1043_s26, %s1319_s26   ;;  %s980_s25 = sphi %s1041_s25, %s1318_s25   ;;  %s976_s24 = sphi %s1039_s24, %s1317_s24  }
   0x7   : > { %p44_p0 = scmp.ne.s32.totalorder %s980_s25, %s976_s24  ;;  %p1301_p1 = scmp.eq.s32.totalorder %s1060_s28, 0 }
   0x8   : > { %p200_p3 = scmp.eq.s32.totalorder %s639_s29, 1  ;;  %p640_p5 = scmp.ge.s32.totalorder %s988_s27, 1 }
   0x9   : > { %p1069_p4 = por %p1301_p1, %p44_p0  ;;  %p207_p7 = scmp.lt.s32.totalorder %s988_s27, 3 }
   0xa   : > { %p1074_p6 = por %p200_p3, %p44_p0  ;;  %s990_s10 = smov [#allocation5]  }
   0xb   : > { %s1304_s30 = scalar_select %p1069_p4, 1, 0 }
   0xc   : > { %s1305_s8 = scalar_select %p1074_p6, 1, 0 }
   0xd   : > { %p1079_p8 = pnand %p640_p5, %p207_p7  ;;  %s225_s11 = sshll.u32 %s990_s10, 4  ;;  %s1083_s11 = int_to_ptr.vmem [resolvable:$true] %s225_s11 }
   0xe   : > { %s991_s13 = smov [#allocation7]   ;;  %s832_s17 = scalar_lea.hbm %s1296_s3, 512 }
   0xf   : > { %p770_p9 = pneg %p1079_p8  ;;  %s241_s14 = sshll.u32 %s991_s13, 4  ;;  %s1094_s14 = int_to_ptr.vmem [resolvable:$true] %s241_s14 }
  0x10   : > { %p833_p12 = scmp.ne.s32.totalorder %s1296_s3, %s832_s17  ;;  %p839_p5 = scmp.lt.u32.totalorder %s832_s17, %s1296_s3 }
  0x11   : > { %p1090_p11 = pnand %p770_p9, %p1301_p1 }
  0x13   : > { %p834_p13 = pneg %p1090_p11 }
  0x15   : > { %p835_p0 = pnand %p834_p13, %p833_p12 }
  0x17   : > { %p836_p3 = pneg %p835_p0 }
  0x19   : > { %p841_p7 = pnand %p839_p5, %p836_p3 }
  0x1b   : > { %844 = shalt.err (!%p841_p7)
}
  0x1c   : > { %s845_s22 = scalar_lea.vmem %s1083_s11, 512  ;;  %p853_p2 = scmp.lt.s32.totalorder %s1083_s11, %s1083_s11 }
  0x1d   : > { %p846_p9 = scmp.ne.s32.totalorder %s1083_s11, %s845_s22  ;;  %p854_p12 = scmp.lt.s32.totalorder %s845_s22, %s845_s22 }
  0x1f   : > { %p848_p10 = pnand %p846_p9, %p834_p13  ;;  %p855_p0 = por %p854_p12, %p853_p2 }
  0x21   : > { %p849_p1 = pneg %p848_p10 }
  0x23   : > { %p856_p6 = pnand %p855_p0, %p849_p1 }
  0x25   : > { %859 = shalt.err (!%p856_p6)
}
  0x26   : > { %s992_s23 = smov 128   ;;  %s993_s29 = smov 8  }
  0x27   : > { %773 = dma.hbm_to_vmem [thread:$0]  (!%p1090_p11), %s1296_s3, 512, %s1083_s11, [#allocation6], %s992_s23, %s992_s23, %s993_s29  }
  0x28   : > { %s860_s17 = scalar_lea.hbm %s1298_s5, 2048 }
  0x29   : > { %p861_p2 = scmp.ne.s32.totalorder %s1298_s5, %s860_s17  ;;  %p867_p10 = scmp.lt.u32.totalorder %s860_s17, %s1298_s5 }
  0x2b   : > { %p863_p1 = pnand %p861_p2, %p834_p13 }
  0x2d   : > { %p864_p6 = pneg %p863_p1 }
  0x2f   : > { %p869_p3 = pnand %p867_p10, %p864_p6 }
  0x31   : > { %872 = shalt.err (!%p869_p3)
}
  0x32   : > { %s873_s11 = scalar_lea.vmem %s1094_s14, 2048  ;;  %p881_p12 = scmp.lt.s32.totalorder %s1094_s14, %s1094_s14 }
  0x33   : > { %p874_p5 = scmp.ne.s32.totalorder %s1094_s14, %s873_s11  ;;  %p882_p0 = scmp.lt.s32.totalorder %s873_s11, %s873_s11 }
  0x35   : > { %p876_p7 = pnand %p874_p5, %p834_p13  ;;  %p883_p2 = por %p882_p0, %p881_p12 }
  0x37   : > { %p877_p9 = pneg %p876_p7 }
  0x39   : > { %p884_p1 = pnand %p883_p2, %p877_p9 }
  0x3b   : > { %887 = shalt.err (!%p884_p1)
}
  0x3c   : > { %776 = dma.hbm_to_vmem [thread:$0]  (!%p1090_p11), %s1298_s5, 2048, %s1094_s14, [#allocation6], %s992_s23, %s992_s23, %s993_s29  }
  0x3d   : > { %s1149_s13 = sadd.s32 1, %s988_s27   ;;  %s31_s12 = sadd.s32 1, %s984_s26 }
  0x3e   : > { %s28_s15 = ssub.s32 %s988_s27, %s1149_s13  ;;  %p38_p13 = scmp.ne.s32.totalorder %s984_s26, %s980_s25 }
  0x3f   : > { %p29_p6 = scmp.eq.s32.totalorder %s28_s15, 0  ;;  %p39_p10 = scmp.eq.s32.totalorder %s988_s27, 0 }
  0x40   : > { %p1308_p3 = scmp.eq.s32.totalorder %s1060_s28, 1  ;;  %p787_p7 = scmp.lt.s32.totalorder %s988_s27, 2 }
  0x41   : > { %s1165_s17 = scalar_select %p29_p6, %s984_s26, %s31_s12  }
  0x42   : > { %p1159_p5 = por %p1308_p3, %p38_p13  ;;  %p40_p9 = por %p39_p10, %p38_p13 }
  0x43   : > { %s258_s18 = sand.u32 1, %s984_s26   ;;  %s645_s14 = sshll.u32 %s988_s27, 7 }
  0x44   : > { %s1309_s16 = scalar_select %p1159_p5, 1, 0 }
  0x45   : > { %s644_s19 = sshll.u32 %s258_s18, 3  ;;  %s1172_s20 = scalar_lea.hbm %s1293_s0, %s645_s14 }
  0x46   : > { %s262_s21 = scalar_lea.vmem [#allocation2], %s644_s19  ;;  %p1176_p11 = pnand %p787_p7, %p40_p9 }
  0x47   : > { %s269_s11 = sshll.u32 %s262_s21, 4  ;;  %s259_s10 = scalar_lea.sflag [#allocation3], %s258_s18  ;;  %s1174_s11 = int_to_ptr.vmem [resolvable:$true] %s269_s11 }
  0x48   : > { %s888_s12 = scalar_lea.hbm %s1172_s20, 128  ;;  %p890_p0 = pneg %p1176_p11 }
  0x49   : > { %p889_p12 = scmp.ne.s32.totalorder %s1172_s20, %s888_s12  ;;  %s893_s14 = scalar_lea.hbm %s1293_s0, 256 }
  0x4a   : > { %p894_p13 = scmp.lt.u32.totalorder %s1172_s20, %s1293_s0  ;;  %p895_p6 = scmp.lt.u32.totalorder %s893_s14, %s888_s12 }
  0x4b   : > { %p891_p2 = pnand %p890_p0, %p889_p12  ;;  %p897_p3 = scmp.lt.u32.totalorder %s888_s12, %s1172_s20 }
  0x4c   : > { %p896_p10 = por %p895_p6, %p894_p13 }
  0x4d   : > { %p892_p1 = pneg %p891_p2 }
  0x4e   : > { %p898_p7 = por %p897_p3, %p896_p10 }
  0x50   : > { %p899_p9 = pnand %p898_p7, %p892_p1 }
  0x52   : > { %902 = shalt.err (!%p899_p9)
}
  0x53   : > { %s903_s18 = scalar_lea.vmem %s1174_s11, 128  ;;  %s994_s21 = smov [#allocation2]  }
  0x54   : > { %p904_p12 = scmp.ne.s32.totalorder %s1174_s11, %s903_s18  ;;  %s908_s15 = sshll.u32 %s994_s21, 4  ;;  %s909_s15 = int_to_ptr.vmem [resolvable:$false] %s908_s15 }
  0x55   : > { %s910_s19 = scalar_lea.vmem %s909_s15, 256  ;;  %p911_p4 = scmp.lt.s32.totalorder %s1174_s11, %s909_s15 }
  0x56   : > { %p906_p2 = pnand %p904_p12, %p890_p0  ;;  %p912_p13 = scmp.lt.s32.totalorder %s910_s19, %s903_s18 }
  0x58   : > { %p907_p5 = pneg %p906_p2  ;;  %p913_p6 = por %p912_p13, %p911_p4 }
  0x5a   : > { %p914_p10 = pnand %p913_p6, %p907_p5 }
  0x5c   : > { %917 = shalt.err (!%p914_p10)
}
  0x5d   : > { %780 = dma.hbm_to_vmem [thread:$0]  (!%p1176_p11), %s1172_s20, 128, %s1174_s11, %s259_s10  }
  0x5e   : > { %278 = sbr.rel (%p1079_p8) target bundleno = 722 (0x2d2), region = 48  ;;  %s1208_s12 = sand.u32 (!%p1079_p8), 1, %s980_s25  }
  0x5f   : > { %s647_s14 = sshll.u32 (!%p1079_p8), %s1208_s12, 3  ;;  %s281_s23 = scalar_lea.sflag (!%p1079_p8), [#allocation3], %s1208_s12 }
  0x60   : > { %s284_s29 = scalar_lea.vmem (!%p1079_p8), [#allocation2], %s647_s14  ;;  %p1311_p4 = scmp.ne.s32.totalorder (!%p1079_p8), %s1304_s30, 0 }
  0x65   : > { %963 = dma.done.wait (%p1311_p4), %s281_s23, 128  }
  0x66   : > { %965 = vsyncadd (%p1311_p4), %s281_s23, 4294967168  ;;  %p1312_p5 = scmp.eq.s32.totalorder %s1060_s28, 0 }
  0x68   : > { %967 = dma.done.wait (%p1312_p5), [#allocation6], 2560   ;;  %p1313_p8 = pmov %p1312_p5 }
  0x69   : > { %vm324_vm0 = vcmask 261120   ;;  %v1222_v0 = vld [vmem:[%s284_s29] sm:$0xff]  ;;  %v357_v4 = vld [vmem:[#allocation5] sm:$0xff]  ;;  %v358_v5 = vld [vmem:[#allocation5 + $0x8] sm:$0xff]  ;;  %v995_v7 = vmov 0.0|0.0   ;;  %vm996_vm1 = vmmov 0  }
  0x6a   : > { %969 = vsyncadd (%p1313_p8), [#allocation6], 4294964736  ;;  %v325_v1 = vsel %vm324_vm0, %v1222_v0, 0.0  ;;  %v328_v2 = vmul.f32 %v1222_v0, %v1222_v0  ;;  %v359_v6 = vld [vmem:[#allocation5 + $0x10] sm:$0xff]  ;;  %728 = vmatprep.subr.bf16.mxu0 %v995_v7  ;;  %v729_v8 = vpack.c.bf16 %v358_v5, %v357_v4  ;;  %v360_v9 = vld [vmem:[#allocation5 + $0x18] sm:$0xff]  ;;  %v997_v10 = vmov 0.0   ;;  %734 = vmatprep.subr.bf16.mxu1 %v995_v7 }
  0x6b   : > { %326 = vadd.xlane.f32.xlu0 %v325_v1  ;;  %690 = vmatprep.mubr.msk.f32.mxu0 %vm996_vm1, %v997_v10  ;;  %v732_v11 = vpack.c.bf16 %v360_v9, %v359_v6  ;;  %v442_v12 = vld [vmem:[#allocation7] sm:$0xff]  ;;  %v443_v13 = vld [vmem:[#allocation7 + $0x8] sm:$0xff]  ;;  %v444_v14 = vld [vmem:[#allocation7 + $0x10] sm:$0xff]  ;;  %s657_s15 = sshll.u32 %s1060_s28, 7  ;;  %s322_s19 = scalar_lea.vmem [#allocation8], %s647_s14 }
  0x6c   : > { %v329_v3 = vsel %vm324_vm0, %v328_v2, 0.0  ;;  %725 = vmatprep.mubr.msk.f32.mxu1 %vm996_vm1, %v997_v10  ;;  %730 = vmatpush3.bf16.msra.mxu0 %v729_v8  ;;  %v735_v15 = vpack.c.bf16 %v443_v13, %v442_v12  ;;  %v445_v16 = vld [vmem:[#allocation7 + $0x18] sm:$0xff]  ;;  %v446_v18 = vld [vmem:[#allocation7 + $0x20] sm:$0xff]  ;;  %v447_v19 = vld [vmem:[#allocation7 + $0x28] sm:$0xff]  ;;  %s550_s23 = sshll.u32 %s322_s19, 4  ;;  %s1249_s9 = scalar_lea.hbm %s1300_s7, %s657_s15  ;;  %s1251_s23 = int_to_ptr.vmem [resolvable:$true] %s550_s23 }
  0x6d   : > { %731 = vmatprep.subr.bf16.mxu0 %v995_v7  ;;  %v738_v17 = vpack.c.bf16 %v445_v16, %v444_v14  ;;  %v741_v20 = vpack.c.bf16 %v447_v19, %v446_v18  ;;  %v448_v21 = vld [vmem:[#allocation7 + $0x30] sm:$0xff]  ;;  %v449_v22 = vld [vmem:[#allocation7 + $0x38] sm:$0xff]  ;;  %v450_v24 = vld [vmem:[#allocation7 + $0x40] sm:$0xff]  ;;  %s537_s20 = scalar_lea.sflag [#allocation4], %s1208_s12  ;;  %s918_s11 = scalar_lea.vmem %s1251_s23, 128 }
  0x6e   : > { %736 = vmatpush3.bf16.msra.mxu1 %v735_v15  ;;  %v744_v23 = vpack.c.bf16 %v449_v22, %v448_v21  ;;  %v451_v25 = vld [vmem:[#allocation7 + $0x48] sm:$0xff]  ;;  %v452_v27 = vld [vmem:[#allocation7 + $0x50] sm:$0xff]  ;;  %v453_v28 = vld [vmem:[#allocation7 + $0x58] sm:$0xff]  ;;  %p919_p11 = scmp.ne.s32.totalorder %s1251_s23, %s918_s11  ;;  %p1314_p0 = scmp.ne.s32.totalorder %s1309_s16, 0 }
  0x6f   : > { %330 = vadd.xlane.f32.xlu0 %v329_v3  ;;  %737 = vmatprep.subr.bf16.mxu1 %v995_v7  ;;  %v747_v26 = vpack.c.bf16 %v451_v25, %v450_v24  ;;  %v750_v29 = vpack.c.bf16 %v453_v28, %v452_v27  ;;  %v454_v30 = vld [vmem:[#allocation7 + $0x60] sm:$0xff]  ;;  %v455_v31 = vld [vmem:[#allocation7 + $0x68] sm:$0xff]  ;;  %v651_v43 = vld [vmem:[%s1294_s1] ss:$0 sm:$0xff]  ;;  %s998_s28 = smov [#allocation8]  }
  0x70   : > { %733 = vmatpush3.bf16.msra.mxu0 %v732_v11  ;;  %v753_v32 = vpack.c.bf16 %v455_v31, %v454_v30  ;;  %v652_v45 = vld [vmem:[%s1295_s2] ss:$0 sm:$0xff]  ;;  %v457_v49 = vld [vmem:[#allocation7 + $0x78] sm:$0xff]  ;;  %p920_p1 = pnand %p919_p11, %p1314_p0  ;;  %s922_s14 = sshll.u32 %s998_s28, 4  ;;  %s923_s14 = int_to_ptr.vmem [resolvable:$false] %s922_s14 }
  0x71   : > { %v456_v48 = vld [vmem:[#allocation7 + $0x70] sm:$0xff]  ;;  %s924_s22 = scalar_lea.vmem %s923_s14, 256  ;;  %p925_p7 = scmp.lt.s32.totalorder %s1251_s23, %s923_s14 }
  0x72   : > { %739 = vmatpush3.bf16.msra.mxu1 %v738_v17  ;;  %v756_v50 = vpack.c.bf16 %v457_v49, %v456_v48  ;;  %v653_v51 = vld [vmem:[%s1297_s4] ss:$0 sm:$0xff]  ;;  %p921_p3 = pneg %p920_p1  ;;  %p926_p9 = scmp.lt.s32.totalorder %s924_s22, %s918_s11 }
  0x73   : > { %740 = vmatprep.subr.bf16.mxu1 %v995_v7  ;;  %v655_v56 = vld [vmem:[%s1299_s6] ss:$0 sm:$0xff] }
  0x74   : > { %p927_p12 = por %p926_p9, %p925_p7 }
  0x76   : > { %742 = vmatpush3.bf16.msra.mxu1 %v741_v20  ;;  %p928_p2 = pnand %p927_p12, %p921_p3 }
  0x77   : > { %743 = vmatprep.subr.bf16.mxu1 %v995_v7 }
  0x7a   : > { %745 = vmatpush3.bf16.msra.mxu1 %v744_v23 }
  0x7b   : > { %746 = vmatprep.subr.bf16.mxu1 %v995_v7 }
  0x7e   : > { %748 = vmatpush3.bf16.msra.mxu1 %v747_v26 }
  0x7f   : > { %749 = vmatprep.subr.bf16.mxu1 %v995_v7 }
  0x82   : > { %751 = vmatpush3.bf16.msra.mxu1 %v750_v29 }
  0x83   : > { %752 = vmatprep.subr.bf16.mxu1 %v995_v7 }
  0x86   : > { %754 = vmatpush3.bf16.msra.mxu1 %v753_v32 }
  0x87   : > { %755 = vmatprep.subr.bf16.mxu1 %v995_v7 }
  0x8a   : > { %757 = vmatpush3.bf16.msra.mxu1 %v756_v50 }
  0xf8   : > { %v327_v33 = vpop.xlane.xlu0 %326 }
  0xf9   : > { %v332_v34 = vmul.f32 0.03125, %v327_v33 }
  0xfb   : > { %v334_v36 = vmul.f32 %v332_v34, %v332_v34  ;;  %v337_v41 = vsub.f32 %v1222_v0, %v332_v34 }
  0xfc   : > { %v331_v35 = vpop.xlane.xlu0 %330 }
  0xfd   : > { %v333_v37 = vmul.f32 0.03125, %v331_v35 }
  0xff   : > { %v335_v38 = vsub.f32 %v333_v37, %v334_v36 }
 0x101   : > { %v336_v39 = vmax.f32 %v335_v38, 0.0 }
 0x103   : > { %v338_v40 = vadd.f32 1e-05, %v336_v39 }
 0x105   : > { %830 = vrsqrt.f32 %v338_v40 }
 0x10f   : > { %v831_v42 = vpop.eup %830 }
 0x110   : > { %v340_v44 = vmul.f32 %v831_v42, %v337_v41 }
 0x112   : > { %v348_v46 = vmul.f32 %v651_v43, %v340_v44 }
 0x114   : > { %v356_v47 = vadd.f32 %v652_v45, %v348_v46 }
 0x116   : > { %691 = vmatmul.mubr.msk.f32.vlgmr.msra.gmra.mrb[0].mxu0 %vm324_vm0, %v356_v47 }
 0x1e9   : > { %v437_v52 = vpop.f32.mrb[0].mxu0 }
 0x1ea   : > { %v438_v53 = vadd.f32 %v653_v51, %v437_v52  ;;  %v692_v54 = vpop.f32.mrb[1].mxu0 }
 0x1ec   : > { %v441_v55 = vmax.f32 %v438_v53, 0.0 }
 0x1ee   : > { %726 = vmatmul.mubr.f32.vlgmr.msra.gmra.mrb[0].mxu1 %v441_v55 }
 0x2c1   : > { %v531_v57 = vpop.f32.mrb[0].mxu1 }
 0x2c2   : > { %v532_v58 = vadd.f32 %v655_v56, %v531_v57  ;;  %v727_v59 = vpop.f32.mrb[1].mxu1 }
 0x2c4   : > { %535 = vst [vmem:[%s322_s19] sm:$0xff] %v532_v58 }
 0x2c5   : > { %931 = shalt.err (!%p928_p2)
}
 0x2c6   : > { %s932_s12 = scalar_lea.hbm %s1249_s9, 128  ;;  %s936_s21 = scalar_lea.hbm %s1300_s7, 256 }
 0x2c7   : > { %p933_p13 = scmp.ne.s32.totalorder %s1249_s9, %s932_s12  ;;  %p937_p4 = scmp.lt.u32.totalorder %s1249_s9, %s1300_s7 }
 0x2c8   : > { %p938_p5 = scmp.lt.u32.totalorder %s936_s21, %s932_s12  ;;  %p940_p11 = scmp.lt.u32.totalorder %s932_s12, %s1249_s9 }
 0x2c9   : > { %p934_p6 = pnand %p933_p13, %p1314_p0 }
 0x2ca   : > { %p939_p8 = por %p938_p5, %p937_p4 }
 0x2cb   : > { %p935_p10 = pneg %p934_p6 }
 0x2cc   : > { %p941_p1 = por %p940_p11, %p939_p8 }
 0x2ce   : > { %p942_p3 = pnand %p941_p1, %p935_p10 }
 0x2d0   : > { %945 = shalt.err (!%p942_p3)
}
 0x2d1   : > { %768 = dma.vmem_to_hbm [thread:$0]  (%p1314_p0), %s1251_s23, 128, %s1249_s9, %s537_s20  }
 0x2d2 PF: > { %s562_s29 = sand.u32 1, %s976_s24   ;;  %p1315_p7 = scmp.ne.s32.totalorder %s1305_s8, 0 }
 0x2d3   : > { %p1316_p9 = scmp.ge.s32.totalorder %s988_s27, 2  ;;  %s563_s30 = scalar_lea.sflag [#allocation4], %s562_s29 }
 0x2d5   : > { %p782_p12 = pnand %p1316_p9, %p1315_p7 }
 0x2d7   : > { %971 = dma.done.wait (!%p782_p12), %s563_s30, 128  }
 0x2d8   : > { %973 = vsyncadd (!%p782_p12), %s563_s30, 4294967168  ;;  %p21_p2 = scmp.ge.s32.totalorder %s1149_s13, 4   ;;  %s1317_s24 = smov %s980_s25 }
 0x2d9   : > { %s1318_s25 = smov %s984_s26  ;;  %s1319_s26 = smov %s1165_s17 }
 0x2da   : > { %s1320_s27 = smov %s1149_s13  ;;  %23 = sbr.rel (!%p21_p2) target bundleno = 6 (0x6), region = 101 }
 0x2e1   :  { %568 = vsyncpa [#allocation3], 1 }
 0x2e2   :  { %570 = vsyncpa [#allocation3 + $0x1], 1 }
 0x2e3   :  { %571 = vsyncpa [#allocation6], 1 }
 0x2e4   :  { %572 = vsyncpa [#allocation4], 1 }
 0x2e5   :  { %574 = vsyncpa [#allocation4 + $0x1], 1 }

</bundles_post_ra>
